<compile_context>
chip_gen: v5e
topology: v5e:2x2
jax: 0.10.0
libtpu: 0.0.40
codegen_flags: <defaults>
</compile_context>

<pallas_src>
import functools
import math

import jax
import jax.numpy as jnp
from jax import lax
from jax.experimental import pallas as pl
from jax.experimental.pallas import tpu as pltpu


# ----------------------------- hardware-aware knobs -------------------------

@functools.lru_cache(maxsize=None)
def _vmem_budget_bytes():
    """~55% of physical VMEM (64 MiB on v7x, 128 MiB on v5e/v6e)."""
    cap = 128 * 1024 * 1024
    try:
        info = pltpu.get_tpu_info()
        cap = int(getattr(info, "vmem_capacity_bytes", cap) or cap)
    except Exception:
        pass
    return int(cap * 0.55)


def _round_up(x, m):
    return (x + m - 1) // m * m


def _plan_dim(dim, pref, align):
    """Return (tile, padded_dim): tile divides padded_dim, tile is a multiple
    of `align` (or tile == dim when dim <= align, which is always legal)."""
    if dim <= align:
        return dim, dim
    pad = _round_up(dim, align)
    t = max(align, (min(pref, pad) // align) * align)
    while pad % t != 0:
        t -= align
    return t, pad


def _pick_div(dim, pref):
    """Largest divisor of dim that is <= pref (head-tile axis)."""
    t = min(dim, pref)
    while dim % t != 0:
        t -= 1
    return t


# --------------------------- tiled linear kernel ----------------------------

def _matmul_kernel(x_ref, w_ref, b_ref, o_ref, acc_ref):
    k = pl.program_id(2)

    @pl.when(k == 0)
    def _():
        acc_ref[...] = jnp.zeros(acc_ref.shape, acc_ref.dtype)

    # bf16 operands in HBM/VMEM -> MXU; accumulate in f32.
    acc_ref[...] += jnp.dot(x_ref[...], w_ref[...],
                            preferred_element_type=jnp.float32)

    @pl.when(k == pl.num_programs(2) - 1)
    def _():
        o_ref[...] = (acc_ref[...] + b_ref[...]).astype(o_ref.dtype)


def linear(x, w, b, *, tm_pref=512, tn_pref=512, tk_pref=1024,
           out_dtype=jnp.bfloat16):
    """y = x @ w + b.  x: (..., K) bf16, w: (K, N) bf16, b: (N,) f32.

    Non-tile-aligned dims are zero-padded (result sliced) so blocks stay
    lane-dense multiples of (8, 128) and tiling is stable as shapes grow."""
    orig_shape = x.shape
    K = orig_shape[-1]
    N = w.shape[1]
    x2d = x.reshape(-1, K)
    M = x2d.shape[0]

    tm, Mp = _plan_dim(M, tm_pref, 8)
    tn, Np = _plan_dim(N, tn_pref, 128)
    tk, Kp = _plan_dim(K, tk_pref, 128)

    if (Mp, Kp) != (M, K):
        x2d = jnp.pad(x2d, ((0, Mp - M), (0, Kp - K)))
    if (Kp, Np) != (K, N):
        w = jnp.pad(w, ((0, Kp - K), (0, Np - N)))
    if Np != N:
        b = jnp.pad(b, ((0, Np - N),))

    y = pl.pallas_call(
        _matmul_kernel,
        out_shape=jax.ShapeDtypeStruct((Mp, Np), out_dtype),
        grid=(Mp // tm, Np // tn, Kp // tk),
        in_specs=[
            pl.BlockSpec((tm, tk), lambda i, j, k: (i, k)),
            pl.BlockSpec((tk, tn), lambda i, j, k: (k, j)),
            pl.BlockSpec((1, tn), lambda i, j, k: (0, j)),
        ],
        out_specs=pl.BlockSpec((tm, tn), lambda i, j, k: (i, j)),
        scratch_shapes=[pltpu.VMEM((tm, tn), jnp.float32)],
        compiler_params=pltpu.CompilerParams(
            dimension_semantics=("parallel", "parallel", "arbitrary"),
            vmem_limit_bytes=_vmem_budget_bytes()),
    )(x2d, w, b.reshape(1, Np))

    if (Mp, Np) != (M, N):
        y = y[:M, :N]
    return y.reshape(orig_shape[:-1] + (N,))


# --------------------- flash-style MLA attention kernel ---------------------

def _flash_attn_kernel(plen_ref, qc_ref, qr_ref, kc_ref, kr_ref, v_ref,
                       o_ref, m_sc, l_sc, acc_sc):
    qi = pl.program_id(2)
    ki = pl.program_id(3)
    nk = pl.num_programs(3)
    past_len = plen_ref[0]

    tq = qc_ref.shape[2]
    tk = kc_ref.shape[2]
    q_first = past_len + qi * tq       # absolute position of first query row
    q_last = q_first + tq - 1
    kv_first = ki * tk                 # absolute position of first key row

    @pl.when(ki == 0)
    def _():
        m_sc[...] = jnp.full(m_sc.shape, -1e30, m_sc.dtype)
        l_sc[...] = jnp.zeros(l_sc.shape, l_sc.dtype)
        acc_sc[...] = jnp.zeros(acc_sc.shape, acc_sc.dtype)

    def _tile_update(apply_mask):
        # Softmax scale is pre-folded into W_UQ, inputs are already bf16:
        # no per-iteration rescale/recast of the q block.
        qc = qc_ref[0]                 # (th, tq, Dh)
        qr = qr_ref[0]
        kc = kc_ref[0]                 # (th, tk, Dh)
        kr = kr_ref[0]

        # s = q_C.k_C^T + q_R.k_R^T (split contraction over [content | rope]).
        s = jnp.einsum("hqd,hkd->hqk", qc, kc,
                       preferred_element_type=jnp.float32)
        s = s + jnp.einsum("hqd,hkd->hqk", qr, kr,
                           preferred_element_type=jnp.float32)

        if apply_mask:
            # 2-D iotas broadcast over heads (only on diagonal-band tiles).
            q_pos = q_first + lax.broadcasted_iota(jnp.int32, (tq, tk), 0)
            k_pos = kv_first + lax.broadcasted_iota(jnp.int32, (tq, tk), 1)
            bias = jnp.where(k_pos <= q_pos, 0.0, -1e30).astype(jnp.float32)
            s = s + bias[None, :, :]

        m_prev = m_sc[...]
        m_new = jnp.maximum(m_prev, jnp.max(s, axis=-1, keepdims=True))
        alpha = jnp.exp(m_prev - m_new)
        p = jnp.exp(s - m_new)

        l_sc[...] = alpha * l_sc[...] + jnp.sum(p, axis=-1, keepdims=True)
        pv = jnp.einsum("hqk,hkd->hqd", p.astype(jnp.bfloat16), v_ref[0],
                        preferred_element_type=jnp.float32)
        acc_sc[...] = alpha * acc_sc[...] + pv
        m_sc[...] = m_new

    # Interior (fully causal-visible) tiles: no mask work at all.
    @pl.when(kv_first + tk - 1 <= q_first)
    def _():
        _tile_update(apply_mask=False)

    # Diagonal-band / padded-tail tiles: apply the causal mask.
    @pl.when(jnp.logical_and(kv_first <= q_last, kv_first + tk - 1 > q_first))
    def _():
        _tile_update(apply_mask=True)

    # Tiles with kv_first > q_last are skipped entirely (and their DMA was
    # clamped away by the kv index_map).

    @pl.when(ki == nk - 1)
    def _():
        inv_l = pl.reciprocal(l_sc[...], approx=True)
        o_ref[0] = (acc_sc[...] * inv_l).astype(o_ref.dtype)


def flash_mla_attention(q_c, q_r, k_c, k_r, v, *, past_len=0,
                        tq_pref=128, tk_pref=256, th_pref=8):
    """q_c/q_r: (B,H,Sq,Dh); k_c/k_r/v: (B,H,Sk,Dh) -> (B,H,Sq,Dh) bf16.

    Softmax scale is assumed pre-folded into the q projection."""
    B, H, Sq, Dh = q_c.shape
    Sk = k_c.shape[2]

    th = _pick_div(H, th_pref)                 # heads per block (VMEM bound)
    tq, Sq_p = _plan_dim(Sq, tq_pref, 8)
    tk, Sk_p = _plan_dim(Sk, tk_pref, 128)     # KV padded to lane-dense tiles

    def _pad_seq(x, s_target):
        s = x.shape[2]
        if s == s_target:
            return x
        return jnp.pad(x, ((0, 0), (0, 0), (0, s_target - s), (0, 0)))

    q_c = _pad_seq(q_c, Sq_p)
    q_r = _pad_seq(q_r, Sq_p)
    k_c = _pad_seq(k_c, Sk_p)
    k_r = _pad_seq(k_r, Sk_p)
    v = _pad_seq(v, Sk_p)

    plen = jnp.full((1,), past_len, jnp.int32)

    def q_map(b, hi, qi, ki, plen_ref):
        return (b, hi, qi, 0)

    def kv_map(b, hi, qi, ki, plen_ref):
        # Clamp the fetched KV block to the causal band: tiles fully above the
        # diagonal re-request an already-fetched block (pipeliner dedups), so
        # their HBM traffic is never issued.  The kernel skips their compute.
        last_band_blk = (plen_ref[0] + (qi + 1) * tq - 1) // tk
        return (b, hi, jnp.minimum(ki, last_band_blk), 0)

    def o_map(b, hi, qi, ki, plen_ref):
        return (b, hi, qi, 0)

    q_spec = pl.BlockSpec((1, th, tq, Dh), q_map)
    kv_spec = pl.BlockSpec((1, th, tk, Dh), kv_map)

    out = pl.pallas_call(
        _flash_attn_kernel,
        out_shape=jax.ShapeDtypeStruct((B, H, Sq_p, Dh), jnp.bfloat16),
        grid_spec=pltpu.PrefetchScalarGridSpec(
            num_scalar_prefetch=1,
            grid=(B, H // th, Sq_p // tq, Sk_p // tk),
            in_specs=[q_spec, q_spec, kv_spec, kv_spec, kv_spec],
            out_specs=pl.BlockSpec((1, th, tq, Dh), o_map),
            scratch_shapes=[
                pltpu.VMEM((th, tq, 1), jnp.float32),    # running max
                pltpu.VMEM((th, tq, 1), jnp.float32),    # running denom
                pltpu.VMEM((th, tq, Dh), jnp.float32),   # running output
            ]),
        compiler_params=pltpu.CompilerParams(
            dimension_semantics=("parallel", "parallel", "parallel",
                                 "arbitrary"),
            vmem_limit_bytes=_vmem_budget_bytes()),
    )(plen, q_c, q_r, k_c, k_r, v)

    if Sq_p != Sq:
        out = out[:, :, :Sq, :]
    return out


# ------------------------------- JAX glue -----------------------------------

def apply_rope(x, past_len=0):
    """Interleaved-pair rotary embedding.  x: (B, H, S, D) (any float dtype)."""
    B, H, S, D = x.shape
    half = D // 2
    pos = jnp.arange(S, dtype=jnp.float32) + float(past_len)
    inv_freq = 1.0 / (10000.0 ** (jnp.arange(half, dtype=jnp.float32) * 2.0 / D))
    ang = pos[:, None] * inv_freq[None, :]                 # (S, half)
    cos = jnp.cos(ang)[None, None]
    sin = jnp.sin(ang)[None, None]
    xf = x.astype(jnp.float32).reshape(B, H, S, half, 2)
    xe, xo = xf[..., 0], xf[..., 1]
    re = xe * cos - xo * sin
    ro = xe * sin + xo * cos
    return jnp.stack([re, ro], axis=-1).reshape(B, H, S, D).astype(x.dtype)


def prepare_params(raw, config):
    """One-time parameter prep (outside the forward path):
      * fuse projections sharing an input: [W_DKV|W_KR|W_DQ], [W_UK|W_UV]
      * fold the softmax scale 1/sqrt(2*Dh) into W_UQ (RoPE is linear, so the
        scale propagates to q_R as well)
      * cast weights to bf16; biases stay f32 (added to the f32 accumulator).
    """
    Dh = config["per_head_dim"]
    scale = 1.0 / math.sqrt(2 * Dh)   # q_t dim is 2*Dh (content + rope)
    p = {}
    p["W_H_w"] = jnp.concatenate(
        [raw["W_DKV_w"], raw["W_KR_w"], raw["W_DQ_w"]], axis=1
    ).astype(jnp.bfloat16)
    p["W_H_b"] = jnp.concatenate(
        [raw["W_DKV_b"], raw["W_KR_b"], raw["W_DQ_b"]], axis=0
    ).astype(jnp.float32)
    p["W_KV_w"] = jnp.concatenate(
        [raw["W_UK_w"], raw["W_UV_w"]], axis=1).astype(jnp.bfloat16)
    p["W_KV_b"] = jnp.concatenate(
        [raw["W_UK_b"], raw["W_UV_b"]], axis=0).astype(jnp.float32)
    p["W_UQ_w"] = (raw["W_UQ_w"] * scale).astype(jnp.bfloat16)
    p["W_UQ_b"] = (raw["W_UQ_b"] * scale).astype(jnp.float32)
    p["W_O_w"] = raw["W_O_w"].astype(jnp.bfloat16)
    p["W_O_b"] = raw["W_O_b"].astype(jnp.float32)
    return p


def mla_forward(h, params, latent_kv_cache=None, kr_cache=None, *, config):
    H = config["num_heads"]
    Dh = config["per_head_dim"]
    d = config["d_model"]
    dc = config["d_model_compressed"]
    B, Sq, _ = h.shape
    past_seq_len = 0 if kr_cache is None else kr_cache.shape[1]

    h = h.astype(jnp.bfloat16)

    # --- fused projections sharing input h: [W_DKV | W_KR | W_DQ] ---
    proj_h = linear(h, params["W_H_w"], params["W_H_b"])   # (B,Sq, dc+d+dqc)
    c_kv_new = proj_h[..., :dc]
    k_R_new = proj_h[..., dc:dc + d]
    c_q = proj_h[..., dc + d:]

    # --- LatentKVAttention / KR cache handling (bf16 caches) ---
    c_kv = (c_kv_new if latent_kv_cache is None
            else jnp.concatenate([latent_kv_cache, c_kv_new], axis=-2))
    latent_kv_cache = c_kv
    k_R_flat = (k_R_new if kr_cache is None
                else jnp.concatenate([kr_cache, k_R_new], axis=-2))
    kr_cache = k_R_flat
    Sk = k_R_flat.shape[1]

    # --- fused projections sharing input c_kv: [W_UK | W_UV] ---
    kv = linear(c_kv, params["W_KV_w"], params["W_KV_b"])  # (B, Sk, 2*H*Dh)
    k_C = kv[..., :H * Dh]
    v_C = kv[..., H * Dh:]

    # --- LatentQAttention (softmax scale already folded into W_UQ) ---
    q_C = linear(c_q, params["W_UQ_w"], params["W_UQ_b"])  # (B, Sq, H*Dh)

    def to_heads(x, S):
        return x.reshape(B, S, H, Dh).transpose(0, 2, 1, 3)

    # TODO(synk): RoPE and the head transposes remain XLA glue (one HBM pass
    # each); fusing them into the attention kernel is a further optimization.
    k_C = to_heads(k_C, Sk)
    v_t = to_heads(v_C, Sk)
    k_R = apply_rope(to_heads(k_R_flat, Sk), past_len=0)
    q_C = to_heads(q_C, Sq)
    q_R = apply_rope(q_C, past_len=past_seq_len)

    # --- causal flash attention + W_O ---
    attn = flash_mla_attention(q_C, q_R, k_C, k_R, v_t,
                               past_len=past_seq_len)      # (B, H, Sq, Dh)
    attn = attn.transpose(0, 2, 1, 3).reshape(B, Sq, H * Dh)
    out = linear(attn, params["W_O_w"], params["W_O_b"])
    return out, latent_kv_cache, kr_cache


# ------------------------------ param init ----------------------------------

def init_linear(key, in_dim, out_dim):
    # Mimic torch nn.Linear default: U(-1/sqrt(in), 1/sqrt(in)) for w and b.
    kw, kb = jax.random.split(key)
    bound = 1.0 / float(in_dim) ** 0.5
    w = jax.random.uniform(kw, (in_dim, out_dim), jnp.float32, -bound, bound)
    b = jax.random.uniform(kb, (out_dim,), jnp.float32, -bound, bound)
    return w, b


if __name__ == "__main__":
    config = dict(d_model=32, num_heads=4, per_head_dim=8,
                  d_model_compressed=16, d_model_prime_compressed=16)
    d = config["d_model"]
    dc = config["d_model_compressed"]
    dqc = config["d_model_prime_compressed"]
    dh_total = config["num_heads"] * config["per_head_dim"]   # == d_model

    key = jax.random.PRNGKey(0)
    ks = jax.random.split(key, 10)
    raw = {}
    raw["W_DKV_w"], raw["W_DKV_b"] = init_linear(ks[0], d, dc)
    raw["W_UK_w"], raw["W_UK_b"] = init_linear(ks[1], dc, dh_total)
    raw["W_UV_w"], raw["W_UV_b"] = init_linear(ks[2], dc, dh_total)
    raw["W_DQ_w"], raw["W_DQ_b"] = init_linear(ks[3], d, dqc)
    raw["W_UQ_w"], raw["W_UQ_b"] = init_linear(ks[4], dqc, dh_total)
    raw["W_KR_w"], raw["W_KR_b"] = init_linear(ks[5], d, d)
    raw["W_O_w"], raw["W_O_b"] = init_linear(ks[6], d, d)
    # W_QR exists in the torch module but is never used in forward -> skipped.

    params = prepare_params(raw, config)   # fusion/scale-fold/bf16 cast: once

    batch, seq = 2, 8
    h = jax.random.normal(ks[8], (batch, seq, d), jnp.float32)

    # Prefill (no caches).
    out, latent_kv_cache, kr_cache = mla_forward(h, params, config=config)
    jax.block_until_ready((out, latent_kv_cache, kr_cache))
    assert out.shape == (batch, seq, d)
    assert latent_kv_cache.shape == (batch, seq, dc)
    assert kr_cache.shape == (batch, seq, d)
    assert bool(jnp.all(jnp.isfinite(out.astype(jnp.float32))))

    # Decode step with caches (past_len > 0, padded KV tile, clamped fetch).
    seq2 = 4
    h2 = jax.random.normal(ks[9], (batch, seq2, d), jnp.float32)
    out2, latent_kv_cache, kr_cache = mla_forward(
        h2, params, latent_kv_cache, kr_cache, config=config)
    jax.block_until_ready((out2, latent_kv_cache, kr_cache))
    assert out2.shape == (batch, seq2, d)
    assert latent_kv_cache.shape == (batch, seq + seq2, dc)
    assert kr_cache.shape == (batch, seq + seq2, d)
    assert bool(jnp.all(jnp.isfinite(out2.astype(jnp.float32))))

    print("KERNEL_OK")
</pallas_src>

<mosaic_0001>
module attributes {stable_mosaic.version = 11 : i64} {
  func.func @_matmul_kernel(%arg0: i32, %arg1: i32, %arg2: i32, %arg3: memref<16x32xbf16, #tpu.memory_space<vmem>>, %arg4: memref<32x64xbf16, #tpu.memory_space<vmem>>, %arg5: memref<1x64xf32, #tpu.memory_space<vmem>>, %arg6: memref<16x64xbf16, #tpu.memory_space<vmem>>, %arg7: memref<16x64xf32, #tpu.memory_space<vmem>>) attributes {dimension_semantics = [#tpu.dimension_semantics<parallel>, #tpu.dimension_semantics<parallel>, #tpu.dimension_semantics<arbitrary>], iteration_bounds = array<i64: 1, 1, 1>, scalar_prefetch = 0 : i64, scratch_operands = 1 : i64, tpu.core_type = #tpu.core_type<tc>, window_params = [{transform_indices = @transform_0, window_bounds = array<i64: 16, 32>}, {transform_indices = @transform_1, window_bounds = array<i64: 32, 64>}, {transform_indices = @transform_2, window_bounds = array<i64: 1, 64>}, {transform_indices = @transform_3, window_bounds = array<i64: 16, 64>}]} {
    %c0_i32 = arith.constant 0 : i32
    %0 = arith.cmpi eq, %arg2, %c0_i32 : i32
    %1 = arith.extui %0 : i1 to i32
    %c0_i32_0 = arith.constant 0 : i32
    %2 = arith.cmpi ne, %1, %c0_i32_0 : i32
    scf.if %2 {
      %cst_10 = arith.constant 0.000000e+00 : f32
      %12 = vector.broadcast %cst_10 : f32 to vector<16x64xf32>
      %c0_11 = arith.constant 0 : index
      %c0_12 = arith.constant 0 : index
      %13 = vector.load %arg7[%c0_11, %c0_12] : memref<16x64xf32, #tpu.memory_space<vmem>>, vector<16x64xf32>
      tpu.vector_store %arg7[%c0_11, %c0_12], %12 {strides = array<i32>} : memref<16x64xf32, #tpu.memory_space<vmem>>, vector<16x64xf32>,
    } else {
    }
    %c0 = arith.constant 0 : index
    %c0_1 = arith.constant 0 : index
    %3 = vector.load %arg7[%c0, %c0_1] : memref<16x64xf32, #tpu.memory_space<vmem>>, vector<16x64xf32>
    %c0_2 = arith.constant 0 : index
    %c0_3 = arith.constant 0 : index
    %4 = vector.load %arg3[%c0_2, %c0_3] : memref<16x32xbf16, #tpu.memory_space<vmem>>, vector<16x32xbf16>
    %c0_4 = arith.constant 0 : index
    %c0_5 = arith.constant 0 : index
    %5 = vector.load %arg4[%c0_4, %c0_5] : memref<32x64xbf16, #tpu.memory_space<vmem>>, vector<32x64xbf16>
    %cst = arith.constant dense<0.000000e+00> : vector<16x64xf32>
    %6 = tpu.matmul %4, %5, %cst {dimension_numbers = #tpu.dot_dimension_numbers<[1], [0], [0], [1], [0, 0, 1, 1], [], []>} : vector<16x32xbf16>, vector<32x64xbf16>, vector<16x64xf32> -> vector<16x64xf32>
    %7 = arith.addf %3, %6 : vector<16x64xf32>
    %c0_6 = arith.constant 0 : index
    %c0_7 = arith.constant 0 : index
    %8 = vector.load %arg7[%c0_6, %c0_7] : memref<16x64xf32, #tpu.memory_space<vmem>>, vector<16x64xf32>
    tpu.vector_store %arg7[%c0_6, %c0_7], %7 {strides = array<i32>} : memref<16x64xf32, #tpu.memory_space<vmem>>, vector<16x64xf32>,
    %c0_i32_8 = arith.constant 0 : i32
    %9 = arith.cmpi eq, %arg2, %c0_i32_8 : i32
    %10 = arith.extui %9 : i1 to i32
    %c0_i32_9 = arith.constant 0 : i32
    %11 = arith.cmpi ne, %10, %c0_i32_9 : i32
    scf.if %11 {
      %c0_10 = arith.constant 0 : index
      %c0_11 = arith.constant 0 : index
      %12 = vector.load %arg7[%c0_10, %c0_11] : memref<16x64xf32, #tpu.memory_space<vmem>>, vector<16x64xf32>
      %c0_12 = arith.constant 0 : index
      %c0_13 = arith.constant 0 : index
      %13 = vector.load %arg5[%c0_12, %c0_13] : memref<1x64xf32, #tpu.memory_space<vmem>>, vector<1x64xf32>
      %14 = vector.broadcast %13 : vector<1x64xf32> to vector<16x64xf32>
      %15 = arith.addf %12, %14 : vector<16x64xf32>
      %16 = arith.truncf %15 : vector<16x64xf32> to vector<16x64xbf16>
      %c0_14 = arith.constant 0 : index
      %c0_15 = arith.constant 0 : index
      %17 = vector.load %arg6[%c0_14, %c0_15] : memref<16x64xbf16, #tpu.memory_space<vmem>>, vector<16x64xbf16>
      tpu.vector_store %arg6[%c0_14, %c0_15], %16 {strides = array<i32>} : memref<16x64xbf16, #tpu.memory_space<vmem>>, vector<16x64xbf16>,
    } else {
    }
    return
  }
  func.func @transform_0(%arg0: i32, %arg1: i32, %arg2: i32) -> (i32, i32) {
    %c0_i32 = arith.constant 0 : i32
    return %arg0, %arg2 : i32, i32
  }
  func.func @transform_1(%arg0: i32, %arg1: i32, %arg2: i32) -> (i32, i32) {
    %c0_i32 = arith.constant 0 : i32
    return %arg2, %arg1 : i32, i32
  }
  func.func @transform_2(%arg0: i32, %arg1: i32, %arg2: i32) -> (i32, i32) {
    %c0_i32 = arith.constant 0 : i32
    %c0_i32_0 = arith.constant 0 : i32
    return %c0_i32, %arg1 : i32, i32
  }
  func.func @transform_3(%arg0: i32, %arg1: i32, %arg2: i32) -> (i32, i32) {
    %c0_i32 = arith.constant 0 : i32
    return %arg0, %arg1 : i32, i32
  }
}

</mosaic_0001>

<bundles_post_ra>
// kernel: tpu_custom_call.1
= control target key start
LH: loop header
LB: loop body
LE: loop exit
PB: predicated region body
PF: predicated region fallthrough
CT: control target
= control target key end

     0   :  { %8 = vsyncpa [#allocation4], 0  ;;  %s291_s0 = inlined_call_operand.hbm [shape: bf16[16,32], index: 0, kind: input, shape index: {}]   ;;  %s292_s1 = inlined_call_operand.hbm [shape: bf16[32,64], index: 1, kind: input, shape index: {}]   ;;  %s293_s2 = inlined_call_operand.vmem [shape: f32[1,64], index: 2, kind: input, shape index: {}]   ;;  %s294_s3 = inlined_call_operand.hbm [shape: bf16[16,64], index: 3, kind: output, shape index: {}]  }
   0x1   :  { %9 = vsyncpa [#allocation7], 0 }
   0x2   :  { %10 = vsyncpa [#allocation5], 0  ;;  %s15_s14 = sshll.u32 %s291_s0, 4  ;;  %s240_s15 = smov [#allocation3]   ;;  %s16_s14 = int_to_ptr.hbm [resolvable:$true] %s15_s14 }
   0x3   :  { %s17_s16 = sshll.u32 %s240_s15, 4  ;;  %s28_s19 = sshll.u32 %s292_s1, 4  ;;  %s18_s16 = int_to_ptr.vmem [resolvable:$true] %s17_s16  ;;  %s29_s19 = int_to_ptr.hbm [resolvable:$true] %s28_s19 }
   0x4   :  { %s241_s20 = smov 64   ;;  %s242_s21 = smov 4  }
   0x5   :  { %23 = dma.hbm_to_vmem [thread:$0]  %s16_s14, 128, %s18_s16, [#allocation4], %s241_s20, %s241_s20, %s242_s21  }
   0x6   :  { %s243_s22 = smov [#allocation6]  }
   0x7   :  { %s30_s23 = sshll.u32 %s243_s22, 4  ;;  %s31_s23 = int_to_ptr.vmem [resolvable:$true] %s30_s23 }
   0x8   :  { %36 = dma.hbm_to_vmem [thread:$0]  %s29_s19, 256, %s31_s23, [#allocation7], %s241_s20, %s241_s20, %s242_s21  }
   0x9   :  { %234 = dma.done.wait [#allocation4], 128  }
   0xa   :  { %235 = vsyncadd [#allocation4], 4294967168 }
   0xb   :  { %236 = dma.done.wait [#allocation7], 256  }
   0xc   :  { %237 = vsyncadd [#allocation7], 4294967040  ;;  %vm52_vm0 = vcmask 523264   ;;  %v244_v0 = vmov 0.0   ;;  %v154_v1 = vld [vmem:[#allocation6 + $0x8] sm:$0xff]  ;;  %v153_v2 = vld [vmem:[#allocation6] sm:$0xff] }
   0xd   :  { %53 = vst.msk [vmem:[#allocation2] sm:$0xff] %vm52_vm0, %v244_v0  ;;  %90 = vmatpush.bf16.msra.mxu0 %v154_v1  ;;  %v152_v3 = vld [vmem:[#allocation3] sm:$0xff]  ;;  %vm80_vm1 = vcmask 261120   ;;  %v161_v8 = vld [vmem:[%s293_s2] ss:$0 sm:$0xff]  ;;  %vm116_vm2 = vcmask 519168  }
   0xe   :  { %54 = vst.msk [vmem:[#allocation2 + $0x8] sm:$0xff] %vm52_vm0, %v244_v0  ;;  %s245_s24 = smov [#allocation8]   ;;  %s125_s28 = sshll.u32 %s294_s3, 4  ;;  %s126_s28 = int_to_ptr.hbm [resolvable:$true] %s125_s28 }
   0xf   :  { %s123_s25 = sshll.u32 %s245_s24, 4  ;;  %s124_s25 = int_to_ptr.vmem [resolvable:$true] %s123_s25 }
  0x11   :  { %91 = vmatpush.bf16.msra.mxu0 %v153_v2 }
  0x14   :  { %151 = vmatmul.msk.bf16.vlgmr.msra.gmra.mxu0 %vm80_vm1, %v152_v3  ;;  %v55_v4 = vld [vmem:[#allocation2] sm:$0xff] }
  0x15   :  { %v56_v7 = vld [vmem:[#allocation2 + $0x8] sm:$0xff] }
  0x91   :  { %v93_v5 = vpop.f32.mrf.mxu0 }
  0x92   :  { %v98_v6 = vadd.f32 %v93_v5, %v55_v4 }
  0x94   :  { %101 = vst.msk [vmem:[#allocation2] sm:$0xff] %vm52_vm0, %v98_v6 }
  0x99   :  { %v95_v9 = vpop.f32.mrf.mxu0 }
  0x9a   :  { %v99_v10 = vadd.f32 %v95_v9, %v56_v7 }
  0x9b   :  { %v106_v11 = vld [vmem:[#allocation2] sm:$0xff] }
  0x9c   :  { %102 = vst.msk [vmem:[#allocation2 + $0x8] sm:$0xff] %vm52_vm0, %v99_v10  ;;  %v112_v12 = vadd.f32 %v161_v8, %v106_v11 }
  0x9e   :  { %v114_v13 = vpack.c.bf16 %v112_v12, %v112_v12 }
  0xa0   :  { %117 = vst.msk [vmem:[#allocation8] sm:$0xf] %vm116_vm2, %v114_v13 }
  0xa3   :  { %v107_v14 = vld [vmem:[#allocation2 + $0x8] sm:$0xff] }
  0xa4   :  { %v113_v15 = vadd.f32 %v161_v8, %v107_v14 }
  0xa6   :  { %v115_v16 = vpack.c.bf16 %v113_v15, %v113_v15 }
  0xa8   :  { %118 = vst.msk [vmem:[#allocation8 + $0x4] sm:$0xf] %vm116_vm2, %v115_v16 }
  0xa9   :  { %131 = dma.vmem_to_hbm [thread:$0]  %s124_s25, 128, %s126_s28, [#allocation5], %s241_s20, %s241_s20, %s242_s21  }
  0xaa   :  { %238 = dma.done.wait [#allocation5], 128  }
  0xab   :  { %239 = vsyncadd [#allocation5], 4294967168 }
  0xac   :  { %136 = vsyncpa [#allocation4], 1 }
  0xad   :  { %137 = vsyncpa [#allocation7], 1 }
  0xae   :  { %138 = vsyncpa [#allocation5], 1 }

</bundles_post_ra>
